<compile_context>
chip_gen: v7x
topology: tpu7x:2x2x1
jax: 0.10.0
libtpu: 0.0.40
codegen_flags: <defaults>
</compile_context>

<pallas_src>
import functools

import jax
import jax.numpy as jnp
from jax import lax
from jax.experimental import pallas as pl
from jax.experimental.pallas import tpu as pltpu


def _mixing_kernel(x_ref, w_ref, o_ref, acc_ref, *,
                   L, tl, tb, l_per_split, chunked, lane_acc):
    # x_ref:   (tb, C, tl)  input in its native dtype (bf16 stays bf16)
    # w_ref:   (1, C)       f32 weight, pre-divided by the true L
    # o_ref:   (1, 1, 1, tb) f32 per-(split, b-tile) partial result
    # acc_ref: (tb, C, 128) f32 lane-resident accumulator, or (tb, C) fallback
    s, b, l = pl.program_id(0), pl.program_id(1), pl.program_id(2)

    @pl.when(l == 0)
    def _init():
        acc_ref[...] = jnp.zeros_like(acc_ref)

    # Valid L elements in this tile, from the *unclamped* global tile index.
    #   rem >= tl  -> fully valid tile (no masking overhead)
    #   0<rem<tl   -> L tail tile: mask lanes >= rem
    #   rem <= 0   -> clamped duplicate tile of the 2nd L split: contribute 0
    rem = L - (s * l_per_split + l) * tl

    if chunked:                      # streaming case: tl is a multiple of 128
        n_chunks = tl // 128

        def accumulate(masked):
            def chunk(i, part):
                off = pl.multiple_of(i * 128, 128)
                xc = x_ref[:, :, pl.ds(off, 128)].astype(jnp.float32)
                if masked:
                    lane = lax.broadcasted_iota(jnp.int32, xc.shape, 2) + i * 128
                    xc = jnp.where(lane < rem, xc, 0.0)
                if not lane_acc:     # large-C fallback: per-chunk lane reduce
                    xc = jnp.sum(xc, axis=-1)
                return part + xc
            part = lax.fori_loop(0, n_chunks, chunk,
                                 jnp.zeros(acc_ref.shape, jnp.float32),
                                 unroll=min(8, n_chunks))
            acc_ref[...] += part

        @pl.when(rem >= tl)
        def _full():
            accumulate(masked=False)

        @pl.when(jnp.logical_and(rem > 0, rem < tl))
        def _tail():
            accumulate(masked=True)
    else:
        # Single L tile (tl == L): whole-tile sum; rem == tl so no masking.
        acc_ref[...] += jnp.sum(x_ref[...].astype(jnp.float32), axis=-1)

    @pl.when(l == pl.num_programs(2) - 1)
    def _finalize():
        # The only cross-lane (XLU) work in the kernel happens here, once.
        col = jnp.sum(acc_ref[...], axis=-1) if lane_acc else acc_ref[...]
        res = jnp.sum(col * w_ref[...], axis=-1)          # (tb,)
        o_ref[...] = res.reshape(1, 1, 1, tb)


def _vmem_capacity_bytes():
    try:
        return int(pltpu.get_tpu_info().vmem_capacity_bytes)
    except Exception:
        return 64 * 1024 * 1024      # conservative (v7x-sized) fallback


def _select_tiles(B, C, L, itemsize, vmem_cap, block_b, block_l):
    budget = vmem_cap // 4                   # per input block (double-buffered)
    size_item = max(itemsize, 4)             # headroom for f32-widening temps
    tb_pref = 16 if itemsize <= 2 else 8
    min_run = max(128, 2048 // itemsize)     # >= 2 KiB contiguous per (b,c) run

    # ---- L tile: grow tl (contiguous HBM axis) first ----
    if block_l is not None:
        tl = L if block_l >= L else max(128, (block_l // 128) * 128)
        tb0 = max(1, min(B, block_b)) if block_b is not None else min(B, tb_pref)
    elif C * L * size_item <= budget:
        tl, tb0 = L, B                       # full-L rows fit: no L tiling
    else:
        tb0 = min(B, tb_pref)
        tl = (budget // (tb0 * C * size_item)) // 128 * 128
        while tb0 > 1 and tl < min_run:      # shrink tb second to keep runs long
            tb0 = max(1, tb0 // 2)
            tl = (budget // (tb0 * C * size_item)) // 128 * 128
        tl = max(128, tl)

    n_l = -(-L // tl)

    # ---- B tile ----
    if block_b is not None:
        tb = max(1, min(block_b, B))
    else:
        if tl >= L:
            tb = max(1, min(B, budget // max(1, C * L * size_item)))
        else:
            tb = max(1, min(tb0, budget // max(1, C * tl * size_item)))
        if B >= 2:                           # >=2 parallel b-tiles (v7x: 2 TCs)
            tb = min(tb, -(-B // 2))
    n_b = -(-B // tb)

    # ---- v7x: if only one b-tile, split L into two parallel halves ----
    n_s = 2 if (n_b == 1 and n_l >= 2) else 1
    l_per_split = -(-n_l // n_s)
    return tb, tl, n_b, n_l, n_s, l_per_split


@functools.partial(jax.jit, static_argnames=("block_b", "block_l"))
def sequence_additive_mixing_coefficient(x, weight, bias, *, block_b=None,
                                         block_l=None):
    """x: (B, C, L); weight: (1, C) (nn.Linear layout); bias: (1,). -> (B, 1)."""
    B, C, L = x.shape
    itemsize = jnp.dtype(x.dtype).itemsize
    vmem_cap = _vmem_capacity_bytes()

    tb, tl, n_b, n_l, n_s, l_per_split = _select_tiles(
        B, C, L, itemsize, vmem_cap, block_b, block_l)
    chunked = n_l > 1                                   # tl % 128 == 0 here
    lane_acc = chunked and (tb * C <= 2048)             # acc <= 1 MiB

    # Host-side prep is O(C) / O(B) only (never O(B*C*L)): fold 1/true-L into
    # the weight so zero-masked tails are exact; bias is added to the result.
    w_scaled = weight.reshape(1, C).astype(jnp.float32) * (1.0 / float(L))

    # VMEM limit derived from the actual blocks (not hard-coded).
    block_bytes = tb * C * tl * itemsize
    acc_bytes = tb * C * (512 if lane_acc else 4)
    temp_bytes = 0 if chunked else tb * C * tl * 4      # possible f32 widen temp
    vmem_limit = (2 * block_bytes + 2 * acc_bytes + temp_bytes
                  + 2 * C * 4 + 2 * tb * 4 + (2 << 20))
    vmem_limit = int(min(max(vmem_limit, 16 << 20),
                         max(vmem_cap - (8 << 20), 16 << 20)))

    kernel = functools.partial(_mixing_kernel, L=L, tl=tl, tb=tb,
                               l_per_split=l_per_split, chunked=chunked,
                               lane_acc=lane_acc)
    acc_shape = (tb, C, 128) if lane_acc else (tb, C)

    def x_index_map(s, b, l):
        g = s * l_per_split + l
        if n_s > 1:                  # clamp the (masked-out) duplicate tile
            g = jnp.minimum(g, n_l - 1)
        return (b, 0, g)

    partials = pl.pallas_call(
        kernel,
        out_shape=jax.ShapeDtypeStruct((n_s, n_b, 1, tb), jnp.float32),
        grid_spec=pltpu.PrefetchScalarGridSpec(
            num_scalar_prefetch=0,
            grid=(n_s, n_b, l_per_split),
            in_specs=[
                pl.BlockSpec((tb, C, tl), x_index_map),         # streamed input
                pl.BlockSpec((1, C), lambda s, b, l: (0, 0)),   # scaled weight
            ],
            out_specs=pl.BlockSpec((1, 1, 1, tb), lambda s, b, l: (s, b, 0, 0)),
            scratch_shapes=[pltpu.VMEM(acc_shape, jnp.float32)],
        ),
        compiler_params=pltpu.CompilerParams(
            dimension_semantics=("parallel", "parallel", "arbitrary"),
            vmem_limit_bytes=vmem_limit,
        ),
        cost_estimate=pl.CostEstimate(
            flops=2 * B * C * L,
            transcendentals=0,
            bytes_accessed=B * C * L * itemsize + C * 4 + n_s * n_b * tb * 4,
        ),
    )(x, w_scaled)

    per_batch = partials.reshape(n_s, n_b * tb)[:, :B]  # drop padded batch cols
    out = jnp.sum(per_batch, axis=0).reshape(B, 1) + bias.reshape(1, 1)
    return out.astype(weight.dtype)


def init_params(key, in_features):
    """nn.Linear(in_features, 1) init: weight (1, C), bias (1,), U(-1/sqrt(C), 1/sqrt(C))."""
    kw, kb = jax.random.split(key)
    bound = 1.0 / jnp.sqrt(jnp.float32(in_features))
    weight = jax.random.uniform(kw, (1, in_features), jnp.float32, -bound, bound)
    bias = jax.random.uniform(kb, (1,), jnp.float32, -bound, bound)
    return weight, bias


def _ref(x, weight, bias):
    return jnp.mean(x.astype(jnp.float32), axis=-1) @ weight.T + bias


if __name__ == "__main__":
    key = jax.random.PRNGKey(0)
    k1, k2, k3, kp = jax.random.split(key, 4)

    # 1) Small shapes consistent with the module: batch=2, channels=4, length=16.
    B, C, L = 2, 4, 16
    x = jax.random.normal(k1, (B, C, L), jnp.float32)
    weight, bias = init_params(kp, C)
    out = jax.block_until_ready(sequence_additive_mixing_coefficient(x, weight, bias))
    assert out.shape == (B, 1)
    assert jnp.allclose(out, _ref(x, weight, bias), atol=1e-5, rtol=1e-5)

    # 2) bf16 input streams at its native width; accumulation stays f32 in-kernel.
    out_bf16 = jax.block_until_ready(
        sequence_additive_mixing_coefficient(x.astype(jnp.bfloat16), weight, bias))
    assert jnp.allclose(out_bf16, _ref(x, weight, bias), atol=2e-2, rtol=2e-2)

    # 3) Streaming path: lane-resident accumulator, masked L tail, partial b-tile.
    B2, C2, L2 = 3, 8, 520
    x2 = jax.random.normal(k2, (B2, C2, L2), jnp.float32)
    w2, b2 = init_params(kp, C2)
    out2 = jax.block_until_ready(
        sequence_additive_mixing_coefficient(x2, w2, b2, block_b=2, block_l=256))
    assert jnp.allclose(out2, _ref(x2, w2, b2), atol=1e-4, rtol=1e-4)

    # 4) B == 1: two parallel L-splits (v7x dual-core path) incl. a clamped tile.
    B3, C3, L3 = 1, 4, 640
    x3 = jax.random.normal(k3, (B3, C3, L3), jnp.float32)
    w3, b3 = init_params(kp, C3)
    out3 = jax.block_until_ready(
        sequence_additive_mixing_coefficient(x3, w3, b3, block_l=128))
    assert jnp.allclose(out3, _ref(x3, w3, b3), atol=1e-4, rtol=1e-4)

    print("KERNEL_OK")
</pallas_src>

<mosaic_0001>
module attributes {stable_mosaic.version = 11 : i64} {
  func.func @_mixing_kernel(%arg0: i32, %arg1: i32, %arg2: i32, %arg3: memref<1x4x16xf32, #tpu.memory_space<vmem>>, %arg4: memref<1x4xf32, #tpu.memory_space<vmem>>, %arg5: memref<1x1x1x1xf32, #tpu.memory_space<vmem>>, %arg6: memref<1x4xf32, #tpu.memory_space<vmem>>) attributes {dimension_semantics = [#tpu.dimension_semantics<parallel>, #tpu.dimension_semantics<parallel>, #tpu.dimension_semantics<arbitrary>], iteration_bounds = array<i64: 1, 2, 1>, scalar_prefetch = 0 : i64, scratch_operands = 1 : i64, tpu.core_type = #tpu.core_type<tc>, window_params = [{transform_indices = @transform_0, window_bounds = array<i64: 1, 4, 16>}, {pipeline_mode = #tpu.pipeline_mode<synchronous>, transform_indices = @transform_1, window_bounds = array<i64: 1, 4>}, {transform_indices = @transform_2, window_bounds = array<i64: 1, 1, 1, 1>}]} {
    %c0_i32 = arith.constant 0 : i32
    %0 = arith.cmpi eq, %arg2, %c0_i32 : i32
    %1 = arith.extui %0 : i1 to i32
    %c0_i32_0 = arith.constant 0 : i32
    %2 = arith.cmpi ne, %1, %c0_i32_0 : i32
    scf.if %2 {
      %cst_9 = arith.constant 0.000000e+00 : f32
      %11 = vector.broadcast %cst_9 : f32 to vector<1x4xf32>
      %c0_10 = arith.constant 0 : index
      %c0_11 = arith.constant 0 : index
      %12 = vector.load %arg6[%c0_10, %c0_11] : memref<1x4xf32, #tpu.memory_space<vmem>>, vector<1x4xf32>
      tpu.vector_store %arg6[%c0_10, %c0_11], %11 {strides = array<i32>} : memref<1x4xf32, #tpu.memory_space<vmem>>, vector<1x4xf32>,
    } else {
    }
    %c0 = arith.constant 0 : index
    %c0_1 = arith.constant 0 : index
    %3 = vector.load %arg6[%c0, %c0_1] : memref<1x4xf32, #tpu.memory_space<vmem>>, vector<1x4xf32>
    %c0_2 = arith.constant 0 : index
    %c0_3 = arith.constant 0 : index
    %c0_4 = arith.constant 0 : index
    %4 = vector.load %arg3[%c0_2, %c0_3, %c0_4] : memref<1x4x16xf32, #tpu.memory_space<vmem>>, vector<1x4x16xf32>
    %cst = arith.constant dense<0.000000e+00> : vector<1x4xf32>
    %5 = vector.multi_reduction <add>, %4, %cst [2] : vector<1x4x16xf32> to vector<1x4xf32>
    %6 = arith.addf %3, %5 : vector<1x4xf32>
    %c0_5 = arith.constant 0 : index
    %c0_6 = arith.constant 0 : index
    %7 = vector.load %arg6[%c0_5, %c0_6] : memref<1x4xf32, #tpu.memory_space<vmem>>, vector<1x4xf32>
    tpu.vector_store %arg6[%c0_5, %c0_6], %6 {strides = array<i32>} : memref<1x4xf32, #tpu.memory_space<vmem>>, vector<1x4xf32>,
    %c0_i32_7 = arith.constant 0 : i32
    %8 = arith.cmpi eq, %arg2, %c0_i32_7 : i32
    %9 = arith.extui %8 : i1 to i32
    %c0_i32_8 = arith.constant 0 : i32
    %10 = arith.cmpi ne, %9, %c0_i32_8 : i32
    scf.if %10 {
      %c0_9 = arith.constant 0 : index
      %c0_10 = arith.constant 0 : index
      %11 = vector.load %arg6[%c0_9, %c0_10] : memref<1x4xf32, #tpu.memory_space<vmem>>, vector<1x4xf32>
      %c0_11 = arith.constant 0 : index
      %c0_12 = arith.constant 0 : index
      %12 = vector.load %arg4[%c0_11, %c0_12] : memref<1x4xf32, #tpu.memory_space<vmem>>, vector<1x4xf32>
      %13 = arith.mulf %11, %12 : vector<1x4xf32>
      %cst_13 = arith.constant dense<0.000000e+00> : vector<1xf32>
      %14 = vector.multi_reduction <add>, %13, %cst_13 [1] : vector<1x4xf32> to vector<1xf32>
      %15 = vector.shape_cast %14 : vector<1xf32> to vector<1x1x1x1xf32>
      %c0_14 = arith.constant 0 : index
      %c0_15 = arith.constant 0 : index
      %c0_16 = arith.constant 0 : index
      %c0_17 = arith.constant 0 : index
      %16 = vector.load %arg5[%c0_14, %c0_15, %c0_16, %c0_17] : memref<1x1x1x1xf32, #tpu.memory_space<vmem>>, vector<1x1x1x1xf32>
      tpu.vector_store %arg5[%c0_14, %c0_15, %c0_16, %c0_17], %15 {strides = array<i32>} : memref<1x1x1x1xf32, #tpu.memory_space<vmem>>, vector<1x1x1x1xf32>,
    } else {
    }
    return
  }
  func.func @transform_0(%arg0: i32, %arg1: i32, %arg2: i32) -> (i32, i32, i32) {
    %c1_i32 = arith.constant 1 : i32
    %0 = arith.muli %arg0, %c1_i32 : i32
    %1 = arith.addi %0, %arg2 : i32
    %c0_i32 = arith.constant 0 : i32
    %c0_i32_0 = arith.constant 0 : i32
    return %arg1, %c0_i32, %1 : i32, i32, i32
  }
  func.func @transform_1(%arg0: i32, %arg1: i32, %arg2: i32) -> (i32, i32) {
    %c0_i32 = arith.constant 0 : i32
    %c0_i32_0 = arith.constant 0 : i32
    %c0_i32_1 = arith.constant 0 : i32
    return %c0_i32, %c0_i32_0 : i32, i32
  }
  func.func @transform_2(%arg0: i32, %arg1: i32, %arg2: i32) -> (i32, i32, i32, i32) {
    %c0_i32 = arith.constant 0 : i32
    %c0_i32_0 = arith.constant 0 : i32
    %c0_i32_1 = arith.constant 0 : i32
    return %arg0, %arg1, %c0_i32, %c0_i32_0 : i32, i32, i32, i32
  }
}

</mosaic_0001>

<bundles_post_ra>
// kernel: sequence_additive_mixing_coefficient.1
= control target key start
LH: loop header
LB: loop body
LE: loop exit
PB: predicated region body
PF: predicated region fallthrough
CT: control target
= control target key end

     0   :  { %s430_s9 = smov 0   ;;  %s432_s10 = smov 0   ;;  %s470_s0 = inlined_call_operand.vmem [shape: f32[2,4,16], index: 0, kind: input, shape index: {}]   ;;  %s471_s1 = inlined_call_operand.vmem [shape: f32[1,4], index: 1, kind: input, shape index: {}]   ;;  %s472_s2 = inlined_call_operand.vmem [shape: f32[1,2,1,1], index: 2, kind: output, shape index: {}]  }
   0x1   :  { %s434_s11 = smov 0  }
   0x2 LB: > { %s27_s12 = sadd.s32 1, %s406_s10  ;;  %p356_p0 = scmp.ge.s32.totalorder %s410_s11, 1  ;;  %s410_s11 = sphi %s434_s11, %s12_s11   ;;  %s406_s10 = sphi %s432_s10, %s474_s10   ;;  %s402_s9 = sphi %s430_s9, %s473_s9  }
   0x3   : > { %p29_p1 = scmp.ge.s32.totalorder %s27_s12, 2  ;;  %p141_p2 = scmp.lt.s32.totalorder %s410_s11, 3 }
   0x5   : > { %s476_s12 = smov (%p29_p1, %s27_s12), 0  ;;  %p142_p3 = pnand %p356_p0, %p141_p2 }
   0x6   : > { %p169_p4 = scmp.lt.s32.totalorder (!%p142_p3), %s402_s9, 1  ;;  %vm192_vm0 = vcmask (!%p142_p3), 125952   ;;  %v412_v2 = vmov (!%p142_p3), 0   ;;  %v197_v3 = vlaneseq (!%p142_p3)  ;;  %v413_v7 = vmov (!%p142_p3), 1966171168  }
   0x7   : > { %145 = sbr.rel (%p142_p3) target bundleno = 461 (0x1cd), region = 28  ;;  %387 = vset.pattern.permute.xlu0 (!%p142_p3), %v412_v2  ;;  %v216_v8 = vunpack.c.l.s4 (!%p142_p3), %v413_v7  ;;  %vm188_vm1 = vcmask (!%p142_p3), 24576   ;;  %v414_v26 = vmov (!%p142_p3), 0.0   ;;  %v268_v33 = vld [vmem:[%s471_s1] sm:$0x1] (!%p142_p3)  ;;  %vm273_vm2 = vcmask (!%p142_p3), 0  }
   0x8   : > { %v198_v4 = vshrl.u32 (!%p142_p3), %v197_v3, 7  ;;  %v241_v5 = vand.u32 (!%p142_p3), 127, %v197_v3  ;;  %189 = vst.msk [vmem:[#allocation2] sm:$0x1] (!%p142_p3), %vm188_vm1, %v414_v26 }
   0x9   : > { %v217_v9 = vunpack.c.0.s8 (!%p142_p3), %v216_v8 }
   0xa   : > { %v244_v6 = vsub.s32 (!%p142_p3), %v241_v5, %v198_v4  ;;  %v199_v10 = vsub.s32 (!%p142_p3), 0, %v198_v4  ;;  %v203_v11 = vsub.s32 (!%p142_p3), 1, %v198_v4  ;;  %v207_v12 = vsub.s32 (!%p142_p3), 2, %v198_v4 }
   0xb   : > { %v211_v13 = vsub.s32 (!%p142_p3), 3, %v198_v4  ;;  %v220_v15 = vsub.s32 (!%p142_p3), %v217_v9, %v198_v4 }
   0xe   : > { %s478_s9 = smov (!%p169_p4, %s402_s9), 1 }
   0xf   : > { %s357_s13 = sshll.u32 %s478_s9, 2  ;;  %v190_v30 = vld [vmem:[#allocation2] sm:$0x1]  ;;  %s183_s21 = scalar_lea.vmem %s472_s2, %s478_s9 }
  0x10   : > { %s175_s16 = scalar_lea.vmem %s470_s0, %s357_s13 }
  0x11   : > { %v191_v0 = vld [vmem:[%s175_s16] sm:$0xf] }
  0x12   : > { %v193_v1 = vsel %vm192_vm0, %v191_v0, 0.0 }
  0x13   : > { %194 = vadd.xlane.f32.xlu0 %v193_v1 }
  0xa0   : > { %v195_v14 = vpop.xlane.xlu0 %194 }
  0xa1   : > { %v200_v16 = vrot.slane %v195_v14, %v199_v10  ;;  %v204_v17 = vrot.slane %v195_v14, %v203_v11  ;;  %v208_v18 = vrot.slane %v195_v14, %v207_v12  ;;  %v212_v19 = vrot.slane %v195_v14, %v211_v13 }
  0xa3   : > { %v213_v20 = vcombine.low %v200_v16, %v204_v17  ;;  %v214_v21 = vcombine.low %v208_v18, %v212_v19 }
  0xa5   : > { %v221_v22 = vrot.slane %v213_v20, %v220_v15  ;;  %v228_v23 = vrot.slane %v214_v21, %v220_v15 }
  0xa7   : > { %v229_v24 = vcombine.low %v221_v22, %v228_v23 }
  0xa9   : > { %v236_v25 = vrot.slane %v229_v24, %v220_v15 }
  0xab   : > { %238 = vperm.xlu0 %387, %v236_v25  }
 0x12a   : > { %v239_v27 = vpop.permute.xlu0 %238 }
 0x12b   : > { %v245_v28 = vrot.slane %v239_v27, %v244_v6 }
 0x12d   : > { %v252_v29 = vrot.slane %v245_v28, %v220_v15 }
 0x12f   : > { %v259_v31 = vrot.slane %v252_v29, %v220_v15 }
 0x131   : > { %v261_v32 = vadd.f32 %v259_v31, %v190_v30 }
 0x133   : > { %263 = vst.msk [vmem:[#allocation2] sm:$0x1] %vm188_vm1, %v261_v32 }
 0x13a   : > { %v267_v34 = vld [vmem:[#allocation2] sm:$0x1] }
 0x13b   : > { %v269_v35 = vmul.f32 %v268_v33, %v267_v34 }
 0x13d   : > { %v270_v36 = vsel %vm188_vm1, %v269_v35, 0.0 }
 0x13e   : > { %271 = vadd.xlane.f32.xlu1 %v270_v36 }
 0x1cb   : > { %v272_v37 = vpop.xlane.xlu1 %271 }
 0x1cc   : > { %274 = vst.msk [vmem:[%s183_s21] sm:$0x1] %vm273_vm2, %v272_v37 }
 0x1cd PF: > { %s12_s11 = sadd.s32 1, %s410_s11   ;;  %s473_s9 = smov %s406_s10 }
 0x1ce   : > { %p9_p5 = scmp.ge.s32.totalorder %s12_s11, 4   ;;  %s474_s10 = smov %s476_s12 }
 0x1d0   :  { %11 = sbr.rel (!%p9_p5) target bundleno = 2 (0x2), region = 66 }

</bundles_post_ra>
